<compile_context>
chip_gen: v5e
topology: v5e:2x2
jax: 0.10.0
libtpu: 0.0.40
codegen_flags: <defaults>
</compile_context>

<pallas_src>
import functools

import numpy as np
import jax
import jax.numpy as jnp
from jax.experimental import pallas as pl
from jax.experimental.pallas import tpu as pltpu


# ----------------------------------------------------------------------------
# Kernel 1: fused QKV projection (scale folded into Q, head-major outputs)
# ----------------------------------------------------------------------------
def _qkv_proj_kernel(x_ref, wqkv_ref, bqkv_ref, q_ref, k_ref, v_ref, *,
                     heads, scale_inv):
    # x_ref: (tn, C); q_ref/k_ref/v_ref: (heads, tn, D)
    C = x_ref.shape[-1]
    D = C // heads
    qkv = jnp.dot(x_ref[...], wqkv_ref[...],
                  preferred_element_type=jnp.float32)        # (tn, 3C), f32 acc
    qkv = qkv + bqkv_ref[...]                                # (1, 3C) broadcasts
    # Split into head-major refs.  The column slice -> lane realignment happens
    # once per projection tile (outside the attention hot loop).
    for h in range(heads):
        q_ref[h] = (qkv[:, 0 * C + h * D:0 * C + (h + 1) * D]
                    * scale_inv).astype(q_ref.dtype)
        k_ref[h] = qkv[:, 1 * C + h * D:1 * C + (h + 1) * D].astype(k_ref.dtype)
        v_ref[h] = qkv[:, 2 * C + h * D:2 * C + (h + 1) * D].astype(v_ref.dtype)


# ----------------------------------------------------------------------------
# Kernel 2: flash attention (online softmax) + fused output projection
# ----------------------------------------------------------------------------
def _flash_attn_kernel(q_ref, k_ref, v_ref, wout_ref, bout_ref, o_ref,
                       m_sc, l_sc, acc_sc, *, heads, compute_dtype,
                       approx_recip):
    kv_idx = pl.program_id(2)
    num_kv = pl.num_programs(2)
    _, tq, D = q_ref.shape
    C = heads * D

    @pl.when(kv_idx == 0)
    def _init():
        m_sc[...] = jnp.full(m_sc.shape, -jnp.inf, m_sc.dtype)
        l_sc[...] = jnp.zeros(l_sc.shape, l_sc.dtype)
        acc_sc[...] = jnp.zeros(acc_sc.shape, acc_sc.dtype)

    # Per-head online softmax.  Head-major refs -> first-axis indexing only
    # (cheap sublane offsets, no lane slicing in the hot loop).
    # TODO(synk): switch to lax.fori_loop over heads for very large head counts
    # (>= 8-16) to bound vreg live ranges.
    for h in range(heads):
        q_h = q_ref[h]                                       # (tq, D)
        k_h = k_ref[h]                                       # (tk, D)
        v_h = v_ref[h]                                       # (tk, D)

        # scores (tq, tk): MXU matmul with f32 accumulation; scale already in Q.
        s = jax.lax.dot_general(q_h, k_h, (((1,), (1,)), ((), ())),
                                preferred_element_type=jnp.float32)

        m_prev = m_sc[h]                                     # (tq, 1)
        m_new = jnp.maximum(m_prev, jnp.max(s, axis=-1, keepdims=True))
        alpha = jnp.exp(m_prev - m_new)                      # (tq, 1)
        p = jnp.exp(s - m_new)                               # (tq, tk)

        l_sc[h] = alpha * l_sc[h] + jnp.sum(p, axis=-1, keepdims=True)
        acc_sc[h] = alpha * acc_sc[h] + jnp.dot(
            p.astype(compute_dtype), v_h, preferred_element_type=jnp.float32)
        m_sc[h] = m_new

    @pl.when(kv_idx == num_kv - 1)
    def _finalize():
        # Normalize (EUP reciprocal + VPU mul) and apply the output projection
        # accumulated per head; runs once per q-tile (outside the kv hot loop)
        # so the head-concat never needs a relayout.
        y = jnp.zeros((tq, C), jnp.float32)
        for h in range(heads):
            inv_l = pl.reciprocal(l_sc[h], approx=approx_recip)  # (tq, 1)
            out_h = (acc_sc[h] * inv_l).astype(compute_dtype)     # (tq, D)
            y = y + jnp.dot(out_h, wout_ref[h * D:(h + 1) * D, :],
                            preferred_element_type=jnp.float32)
        o_ref[...] = (y + bout_ref[...]).astype(o_ref.dtype)


# ----------------------------------------------------------------------------
# Helpers
# ----------------------------------------------------------------------------
def _pick_tile(n, preferred):
    """Largest divisor of n that is <= preferred, preferring multiples of 128
    (lane / MXU width), then multiples of 8 (sublane), else n itself."""
    if n <= preferred:
        return n
    best8 = None
    for t in range(min(preferred, n), 7, -1):
        if n % t:
            continue
        if t % 128 == 0:
            return t
        if best8 is None and t % 8 == 0:
            best8 = t
    return best8 if best8 is not None else n


def _const_spec(shape, index_map):
    """BlockSpec for a block whose index never changes across the grid:
    single-buffer it (no point double-buffering a resident weight) when the
    running JAX exposes pipeline_mode / pl.Buffered."""
    if hasattr(pl, "Buffered"):
        try:
            return pl.BlockSpec(shape, index_map, pipeline_mode=pl.Buffered(1))
        except TypeError:
            pass
    return pl.BlockSpec(shape, index_map)


# ----------------------------------------------------------------------------
# Wrapper
# ----------------------------------------------------------------------------
def multihead_attention(x, w_qkv, b_qkv, w_out, b_out, *, heads,
                        compute_dtype=jnp.bfloat16,
                        q_tile=256, kv_tile=256, n_tile=512,
                        vmem_limit_bytes=None):
    """x: (B, N, C); w_qkv: (C, 3C); b_qkv: (1, 3C) or (3C,);
    w_out: (C, C); b_out: (1, C) or (C,).  Weights stored (in, out), i.e.
    transposed w.r.t. torch.nn.Linear, so the kernel computes x @ W + b.

    compute_dtype: MXU operand dtype (default bf16, f32 accumulation).
    """
    B, N, C = x.shape
    assert C % heads == 0, "embed_dim must be divisible by heads"
    D = C // heads
    out_dtype = x.dtype
    scale_inv = 1.0 / (float(C) ** 0.5)     # module scales by embed_dim ** 0.5
    approx_recip = np.dtype(compute_dtype) != np.dtype(np.float32)
    cd_size = np.dtype(compute_dtype).itemsize

    # Cast MXU operands once in the wrapper (halves weight / activation DMA
    # when bf16); biases stay f32 (added post-accumulation).
    xc = x.astype(compute_dtype)
    w_qkv_c = w_qkv.astype(compute_dtype)
    w_out_c = w_out.astype(compute_dtype)
    b_qkv_f = b_qkv.astype(jnp.float32).reshape(1, 3 * C)
    b_out_f = b_out.astype(jnp.float32).reshape(1, C)

    cp_kwargs = {}
    if vmem_limit_bytes is not None:
        cp_kwargs["vmem_limit_bytes"] = vmem_limit_bytes

    # ---- Kernel 1: fused QKV projection (head-major outputs) ---------------
    tn = _pick_tile(N, n_tile)
    assert N % tn == 0
    k1_flops = 2 * B * N * C * 3 * C
    k1_bytes = int(B * N * C * cd_size + C * 3 * C * cd_size + 3 * C * 4
                   + 3 * B * N * C * cd_size)
    q, k, v = pl.pallas_call(
        functools.partial(_qkv_proj_kernel, heads=heads, scale_inv=scale_inv),
        out_shape=tuple(jax.ShapeDtypeStruct((B, heads, N, D), compute_dtype)
                        for _ in range(3)),
        grid_spec=pltpu.PrefetchScalarGridSpec(
            num_scalar_prefetch=0,
            grid=(B, N // tn),
            in_specs=[
                pl.BlockSpec((None, tn, C), lambda b, n: (b, n, 0)),     # x
                _const_spec((C, 3 * C), lambda b, n: (0, 0)),            # W_qkv
                _const_spec((1, 3 * C), lambda b, n: (0, 0)),            # b_qkv
            ],
            out_specs=tuple(
                pl.BlockSpec((None, heads, tn, D), lambda b, n: (b, 0, n, 0))
                for _ in range(3)),
        ),
        compiler_params=pltpu.CompilerParams(
            dimension_semantics=("parallel", "parallel"), **cp_kwargs),
        cost_estimate=pl.CostEstimate(flops=k1_flops, transcendentals=0,
                                      bytes_accessed=k1_bytes),
    )(xc, w_qkv_c, b_qkv_f)

    # ---- Kernel 2: flash attention + fused output projection ---------------
    tq = _pick_tile(N, q_tile)
    tk = _pick_tile(N, kv_tile)
    assert N % tq == 0 and N % tk == 0

    k2_flops = 4 * B * heads * N * N * D + 2 * B * N * C * C
    k2_trans = B * heads * N * N
    k2_bytes = int(B * heads * N * D * cd_size * (1 + 2 * (N // tq))
                   + C * C * cd_size + C * 4
                   + B * N * C * np.dtype(out_dtype).itemsize)

    kernel = functools.partial(_flash_attn_kernel, heads=heads,
                               compute_dtype=compute_dtype,
                               approx_recip=approx_recip)
    y = pl.pallas_call(
        kernel,
        out_shape=jax.ShapeDtypeStruct((B, N, C), out_dtype),
        grid_spec=pltpu.PrefetchScalarGridSpec(
            num_scalar_prefetch=0,
            grid=(B, N // tq, N // tk),
            in_specs=[
                pl.BlockSpec((None, heads, tq, D),
                             lambda b, qi, ki: (b, 0, qi, 0)),           # Q
                pl.BlockSpec((None, heads, tk, D),
                             lambda b, qi, ki: (b, 0, ki, 0)),           # K
                pl.BlockSpec((None, heads, tk, D),
                             lambda b, qi, ki: (b, 0, ki, 0)),           # V
                _const_spec((C, C), lambda b, qi, ki: (0, 0)),           # W_out
                _const_spec((1, C), lambda b, qi, ki: (0, 0)),           # b_out
            ],
            out_specs=pl.BlockSpec((None, tq, C), lambda b, qi, ki: (b, qi, 0)),
            scratch_shapes=[
                pltpu.VMEM((heads, tq, 1), jnp.float32),   # running max m
                pltpu.VMEM((heads, tq, 1), jnp.float32),   # running denom l
                pltpu.VMEM((heads, tq, D), jnp.float32),   # running acc
            ],
        ),
        compiler_params=pltpu.CompilerParams(
            dimension_semantics=("parallel", "parallel", "arbitrary"),
            **cp_kwargs),
        cost_estimate=pl.CostEstimate(flops=k2_flops, transcendentals=k2_trans,
                                      bytes_accessed=k2_bytes),
    )(q, k, v, w_out_c, b_out_f)
    return y


# ----------------------------------------------------------------------------
# Pure-JAX reference (matches the PyTorch module semantics)
# ----------------------------------------------------------------------------
def _reference(x, w_qkv, b_qkv, w_out, b_out, heads):
    B, N, C = x.shape
    D = C // heads
    qkv = x @ w_qkv + b_qkv.reshape(-1)
    q, k, v = jnp.split(qkv, 3, axis=-1)

    def to_heads(t):
        return t.reshape(B, N, heads, D).transpose(0, 2, 1, 3)

    q, k, v = map(to_heads, (q, k, v))
    scores = jnp.einsum('bhnd,bhmd->bhnm', q, k) / (C ** 0.5)
    attn = jax.nn.softmax(scores, axis=-1)
    out = jnp.einsum('bhnm,bhmd->bhnd', attn, v)
    out = out.transpose(0, 2, 1, 3).reshape(B, N, C)
    return out @ w_out + b_out.reshape(-1)


if __name__ == "__main__":
    # --- small shapes consistent with the module's forward -------------------
    B, N, C, heads = 2, 8, 32, 4

    key = jax.random.PRNGKey(0)
    kx, k1, k2, k3, k4 = jax.random.split(key, 5)

    x = jax.random.normal(kx, (B, N, C), dtype=jnp.float32)
    w_qkv = jax.random.normal(k1, (C, 3 * C), dtype=jnp.float32) * 0.05
    b_qkv = jax.random.normal(k2, (1, 3 * C), dtype=jnp.float32) * 0.05
    w_out = jax.random.normal(k3, (C, C), dtype=jnp.float32) * 0.05
    b_out = jax.random.normal(k4, (1, C), dtype=jnp.float32) * 0.05

    y_ref = _reference(x, w_qkv, b_qkv, w_out, b_out, heads)

    # f32 MXU-operand path (exact reciprocal): tight check.
    y32 = multihead_attention(x, w_qkv, b_qkv, w_out, b_out, heads=heads,
                              compute_dtype=jnp.float32)
    y32 = jax.block_until_ready(y32)
    assert y32.shape == (B, N, C)
    assert jnp.allclose(y32, y_ref, atol=2e-3, rtol=2e-3), "f32 mismatch vs reference"

    # Default bf16 MXU-operand path (f32 accumulation): looser check.
    ybf = multihead_attention(x, w_qkv, b_qkv, w_out, b_out, heads=heads)
    ybf = jax.block_until_ready(ybf)
    assert ybf.shape == (B, N, C)
    assert jnp.allclose(ybf, y_ref, atol=5e-2, rtol=5e-2), "bf16 mismatch vs reference"

    # Medium shape exercising real tiling + multi-step online softmax
    # (kernel-2 grid = (1, 2, 2) with the KV axis as the reduction axis).
    B2, N2, C2, H2 = 1, 256, 128, 2
    kx2, k5, k6, k7, k8 = jax.random.split(jax.random.PRNGKey(1), 5)
    x2 = jax.random.normal(kx2, (B2, N2, C2), dtype=jnp.float32)
    w_qkv2 = jax.random.normal(k5, (C2, 3 * C2), dtype=jnp.float32) * 0.05
    b_qkv2 = jax.random.normal(k6, (1, 3 * C2), dtype=jnp.float32) * 0.05
    w_out2 = jax.random.normal(k7, (C2, C2), dtype=jnp.float32) * 0.05
    b_out2 = jax.random.normal(k8, (1, C2), dtype=jnp.float32) * 0.05

    y2_ref = _reference(x2, w_qkv2, b_qkv2, w_out2, b_out2, H2)

    y2_32 = multihead_attention(x2, w_qkv2, b_qkv2, w_out2, b_out2, heads=H2,
                                compute_dtype=jnp.float32,
                                q_tile=128, kv_tile=128)
    y2_32 = jax.block_until_ready(y2_32)
    assert jnp.allclose(y2_32, y2_ref, atol=2e-3, rtol=2e-3), "tiled f32 mismatch"

    y2_bf = multihead_attention(x2, w_qkv2, b_qkv2, w_out2, b_out2, heads=H2,
                                q_tile=128, kv_tile=128)
    y2_bf = jax.block_until_ready(y2_bf)
    assert jnp.allclose(y2_bf, y2_ref, atol=5e-2, rtol=5e-2), "tiled bf16 mismatch"

    print("KERNEL_OK")
</pallas_src>

<mosaic_0001>
module attributes {stable_mosaic.version = 11 : i64} {
  func.func @_qkv_proj_kernel(%arg0: i32, %arg1: i32, %arg2: memref<1x8x32xf32, #tpu.memory_space<vmem>>, %arg3: memref<32x96xf32, #tpu.memory_space<vmem>>, %arg4: memref<1x96xf32, #tpu.memory_space<vmem>>, %arg5: memref<1x4x8x8xf32, #tpu.memory_space<vmem>>, %arg6: memref<1x4x8x8xf32, #tpu.memory_space<vmem>>, %arg7: memref<1x4x8x8xf32, #tpu.memory_space<vmem>>) attributes {dimension_semantics = [#tpu.dimension_semantics<parallel>, #tpu.dimension_semantics<parallel>], iteration_bounds = array<i64: 2, 1>, scalar_prefetch = 0 : i64, scratch_operands = 0 : i64, tpu.core_type = #tpu.core_type<tc>, window_params = [{transform_indices = @transform_0, window_bounds = array<i64: 1, 8, 32>}, {pipeline_mode = #tpu.pipeline_mode<synchronous>, transform_indices = @transform_1, window_bounds = array<i64: 32, 96>}, {pipeline_mode = #tpu.pipeline_mode<synchronous>, transform_indices = @transform_2, window_bounds = array<i64: 1, 96>}, {transform_indices = @transform_3, window_bounds = array<i64: 1, 4, 8, 8>}, {transform_indices = @transform_4, window_bounds = array<i64: 1, 4, 8, 8>}, {transform_indices = @transform_5, window_bounds = array<i64: 1, 4, 8, 8>}]} {
    %c0 = arith.constant 0 : index
    %c0_0 = arith.constant 0 : index
    %c0_1 = arith.constant 0 : index
    %0 = vector.load %arg2[%c0, %c0_0, %c0_1] : memref<1x8x32xf32, #tpu.memory_space<vmem>>, vector<1x8x32xf32>
    %1 = vector.shape_cast %0 : vector<1x8x32xf32> to vector<8x32xf32>
    %c0_2 = arith.constant 0 : index
    %c0_3 = arith.constant 0 : index
    %2 = vector.load %arg3[%c0_2, %c0_3] : memref<32x96xf32, #tpu.memory_space<vmem>>, vector<32x96xf32>
    %cst = arith.constant dense<0.000000e+00> : vector<8x96xf32>
    %3 = tpu.matmul %1, %2, %cst {dimension_numbers = #tpu.dot_dimension_numbers<[1], [0], [0], [1], [0, 0, 1, 1], [], []>} : vector<8x32xf32>, vector<32x96xf32>, vector<8x96xf32> -> vector<8x96xf32>
    %c0_4 = arith.constant 0 : index
    %c0_5 = arith.constant 0 : index
    %4 = vector.load %arg4[%c0_4, %c0_5] : memref<1x96xf32, #tpu.memory_space<vmem>>, vector<1x96xf32>
    %5 = vector.broadcast %4 : vector<1x96xf32> to vector<8x96xf32>
    %6 = arith.addf %3, %5 : vector<8x96xf32>
    %7 = vector.extract_strided_slice %6 {offsets = [0, 0], sizes = [8, 8], strides = [1, 1]} : vector<8x96xf32> to vector<8x8xf32>
    %cst_6 = arith.constant 0.176776692 : f32
    %8 = vector.broadcast %cst_6 : f32 to vector<8x8xf32>
    %9 = arith.mulf %7, %8 : vector<8x8xf32>
    %c0_7 = arith.constant 0 : index
    %c0_8 = arith.constant 0 : index
    %c0_9 = arith.constant 0 : index
    %c0_10 = arith.constant 0 : index
    %10 = vector.load %arg5[%c0_7, %c0_8, %c0_9, %c0_10] : memref<1x4x8x8xf32, #tpu.memory_space<vmem>>, vector<1x1x8x8xf32>
    %11 = vector.shape_cast %10 : vector<1x1x8x8xf32> to vector<8x8xf32>
    %12 = vector.shape_cast %9 : vector<8x8xf32> to vector<1x1x8x8xf32>
    tpu.vector_store %arg5[%c0_7, %c0_8, %c0_9, %c0_10], %12 {strides = array<i32>} : memref<1x4x8x8xf32, #tpu.memory_space<vmem>>, vector<1x1x8x8xf32>,
    %13 = vector.extract_strided_slice %6 {offsets = [0, 32], sizes = [8, 8], strides = [1, 1]} : vector<8x96xf32> to vector<8x8xf32>
    %c0_11 = arith.constant 0 : index
    %c0_12 = arith.constant 0 : index
    %c0_13 = arith.constant 0 : index
    %c0_14 = arith.constant 0 : index
    %14 = vector.load %arg6[%c0_11, %c0_12, %c0_13, %c0_14] : memref<1x4x8x8xf32, #tpu.memory_space<vmem>>, vector<1x1x8x8xf32>
    %15 = vector.shape_cast %14 : vector<1x1x8x8xf32> to vector<8x8xf32>
    %16 = vector.shape_cast %13 : vector<8x8xf32> to vector<1x1x8x8xf32>
    tpu.vector_store %arg6[%c0_11, %c0_12, %c0_13, %c0_14], %16 {strides = array<i32>} : memref<1x4x8x8xf32, #tpu.memory_space<vmem>>, vector<1x1x8x8xf32>,
    %17 = vector.extract_strided_slice %6 {offsets = [0, 64], sizes = [8, 8], strides = [1, 1]} : vector<8x96xf32> to vector<8x8xf32>
    %c0_15 = arith.constant 0 : index
    %c0_16 = arith.constant 0 : index
    %c0_17 = arith.constant 0 : index
    %c0_18 = arith.constant 0 : index
    %18 = vector.load %arg7[%c0_15, %c0_16, %c0_17, %c0_18] : memref<1x4x8x8xf32, #tpu.memory_space<vmem>>, vector<1x1x8x8xf32>
    %19 = vector.shape_cast %18 : vector<1x1x8x8xf32> to vector<8x8xf32>
    %20 = vector.shape_cast %17 : vector<8x8xf32> to vector<1x1x8x8xf32>
    tpu.vector_store %arg7[%c0_15, %c0_16, %c0_17, %c0_18], %20 {strides = array<i32>} : memref<1x4x8x8xf32, #tpu.memory_space<vmem>>, vector<1x1x8x8xf32>,
    %21 = vector.extract_strided_slice %6 {offsets = [0, 8], sizes = [8, 8], strides = [1, 1]} : vector<8x96xf32> to vector<8x8xf32>
    %cst_19 = arith.constant 0.176776692 : f32
    %22 = vector.broadcast %cst_19 : f32 to vector<8x8xf32>
    %23 = arith.mulf %21, %22 : vector<8x8xf32>
    %c0_20 = arith.constant 0 : index
    %c1 = arith.constant 1 : index
    %c0_21 = arith.constant 0 : index
    %c0_22 = arith.constant 0 : index
    %24 = vector.load %arg5[%c0_20, %c1, %c0_21, %c0_22] : memref<1x4x8x8xf32, #tpu.memory_space<vmem>>, vector<1x1x8x8xf32>
    %25 = vector.shape_cast %24 : vector<1x1x8x8xf32> to vector<8x8xf32>
    %26 = vector.shape_cast %23 : vector<8x8xf32> to vector<1x1x8x8xf32>
    tpu.vector_store %arg5[%c0_20, %c1, %c0_21, %c0_22], %26 {strides = array<i32>} : memref<1x4x8x8xf32, #tpu.memory_space<vmem>>, vector<1x1x8x8xf32>,
    %27 = vector.extract_strided_slice %6 {offsets = [0, 40], sizes = [8, 8], strides = [1, 1]} : vector<8x96xf32> to vector<8x8xf32>
    %c0_23 = arith.constant 0 : index
    %c1_24 = arith.constant 1 : index
    %c0_25 = arith.constant 0 : index
    %c0_26 = arith.constant 0 : index
    %28 = vector.load %arg6[%c0_23, %c1_24, %c0_25, %c0_26] : memref<1x4x8x8xf32, #tpu.memory_space<vmem>>, vector<1x1x8x8xf32>
    %29 = vector.shape_cast %28 : vector<1x1x8x8xf32> to vector<8x8xf32>
    %30 = vector.shape_cast %27 : vector<8x8xf32> to vector<1x1x8x8xf32>
    tpu.vector_store %arg6[%c0_23, %c1_24, %c0_25, %c0_26], %30 {strides = array<i32>} : memref<1x4x8x8xf32, #tpu.memory_space<vmem>>, vector<1x1x8x8xf32>,
    %31 = vector.extract_strided_slice %6 {offsets = [0, 72], sizes = [8, 8], strides = [1, 1]} : vector<8x96xf32> to vector<8x8xf32>
    %c0_27 = arith.constant 0 : index
    %c1_28 = arith.constant 1 : index
    %c0_29 = arith.constant 0 : index
    %c0_30 = arith.constant 0 : index
    %32 = vector.load %arg7[%c0_27, %c1_28, %c0_29, %c0_30] : memref<1x4x8x8xf32, #tpu.memory_space<vmem>>, vector<1x1x8x8xf32>
    %33 = vector.shape_cast %32 : vector<1x1x8x8xf32> to vector<8x8xf32>
    %34 = vector.shape_cast %31 : vector<8x8xf32> to vector<1x1x8x8xf32>
    tpu.vector_store %arg7[%c0_27, %c1_28, %c0_29, %c0_30], %34 {strides = array<i32>} : memref<1x4x8x8xf32, #tpu.memory_space<vmem>>, vector<1x1x8x8xf32>,
    %35 = vector.extract_strided_slice %6 {offsets = [0, 16], sizes = [8, 8], strides = [1, 1]} : vector<8x96xf32> to vector<8x8xf32>
    %cst_31 = arith.constant 0.176776692 : f32
    %36 = vector.broadcast %cst_31 : f32 to vector<8x8xf32>
    %37 = arith.mulf %35, %36 : vector<8x8xf32>
    %c0_32 = arith.constant 0 : index
    %c2 = arith.constant 2 : index
    %c0_33 = arith.constant 0 : index
    %c0_34 = arith.constant 0 : index
    %38 = vector.load %arg5[%c0_32, %c2, %c0_33, %c0_34] : memref<1x4x8x8xf32, #tpu.memory_space<vmem>>, vector<1x1x8x8xf32>
    %39 = vector.shape_cast %38 : vector<1x1x8x8xf32> to vector<8x8xf32>
    %40 = vector.shape_cast %37 : vector<8x8xf32> to vector<1x1x8x8xf32>
    tpu.vector_store %arg5[%c0_32, %c2, %c0_33, %c0_34], %40 {strides = array<i32>} : memref<1x4x8x8xf32, #tpu.memory_space<vmem>>, vector<1x1x8x8xf32>,
    %41 = vector.extract_strided_slice %6 {offsets = [0, 48], sizes = [8, 8], strides = [1, 1]} : vector<8x96xf32> to vector<8x8xf32>
    %c0_35 = arith.constant 0 : index
    %c2_36 = arith.constant 2 : index
    %c0_37 = arith.constant 0 : index
    %c0_38 = arith.constant 0 : index
    %42 = vector.load %arg6[%c0_35, %c2_36, %c0_37, %c0_38] : memref<1x4x8x8xf32, #tpu.memory_space<vmem>>, vector<1x1x8x8xf32>
    %43 = vector.shape_cast %42 : vector<1x1x8x8xf32> to vector<8x8xf32>
    %44 = vector.shape_cast %41 : vector<8x8xf32> to vector<1x1x8x8xf32>
    tpu.vector_store %arg6[%c0_35, %c2_36, %c0_37, %c0_38], %44 {strides = array<i32>} : memref<1x4x8x8xf32, #tpu.memory_space<vmem>>, vector<1x1x8x8xf32>,
    %45 = vector.extract_strided_slice %6 {offsets = [0, 80], sizes = [8, 8], strides = [1, 1]} : vector<8x96xf32> to vector<8x8xf32>
    %c0_39 = arith.constant 0 : index
    %c2_40 = arith.constant 2 : index
    %c0_41 = arith.constant 0 : index
    %c0_42 = arith.constant 0 : index
    %46 = vector.load %arg7[%c0_39, %c2_40, %c0_41, %c0_42] : memref<1x4x8x8xf32, #tpu.memory_space<vmem>>, vector<1x1x8x8xf32>
    %47 = vector.shape_cast %46 : vector<1x1x8x8xf32> to vector<8x8xf32>
    %48 = vector.shape_cast %45 : vector<8x8xf32> to vector<1x1x8x8xf32>
    tpu.vector_store %arg7[%c0_39, %c2_40, %c0_41, %c0_42], %48 {strides = array<i32>} : memref<1x4x8x8xf32, #tpu.memory_space<vmem>>, vector<1x1x8x8xf32>,
    %49 = vector.extract_strided_slice %6 {offsets = [0, 24], sizes = [8, 8], strides = [1, 1]} : vector<8x96xf32> to vector<8x8xf32>
    %cst_43 = arith.constant 0.176776692 : f32
    %50 = vector.broadcast %cst_43 : f32 to vector<8x8xf32>
    %51 = arith.mulf %49, %50 : vector<8x8xf32>
    %c0_44 = arith.constant 0 : index
    %c3 = arith.constant 3 : index
    %c0_45 = arith.constant 0 : index
    %c0_46 = arith.constant 0 : index
    %52 = vector.load %arg5[%c0_44, %c3, %c0_45, %c0_46] : memref<1x4x8x8xf32, #tpu.memory_space<vmem>>, vector<1x1x8x8xf32>
    %53 = vector.shape_cast %52 : vector<1x1x8x8xf32> to vector<8x8xf32>
    %54 = vector.shape_cast %51 : vector<8x8xf32> to vector<1x1x8x8xf32>
    tpu.vector_store %arg5[%c0_44, %c3, %c0_45, %c0_46], %54 {strides = array<i32>} : memref<1x4x8x8xf32, #tpu.memory_space<vmem>>, vector<1x1x8x8xf32>,
    %55 = vector.extract_strided_slice %6 {offsets = [0, 56], sizes = [8, 8], strides = [1, 1]} : vector<8x96xf32> to vector<8x8xf32>
    %c0_47 = arith.constant 0 : index
    %c3_48 = arith.constant 3 : index
    %c0_49 = arith.constant 0 : index
    %c0_50 = arith.constant 0 : index
    %56 = vector.load %arg6[%c0_47, %c3_48, %c0_49, %c0_50] : memref<1x4x8x8xf32, #tpu.memory_space<vmem>>, vector<1x1x8x8xf32>
    %57 = vector.shape_cast %56 : vector<1x1x8x8xf32> to vector<8x8xf32>
    %58 = vector.shape_cast %55 : vector<8x8xf32> to vector<1x1x8x8xf32>
    tpu.vector_store %arg6[%c0_47, %c3_48, %c0_49, %c0_50], %58 {strides = array<i32>} : memref<1x4x8x8xf32, #tpu.memory_space<vmem>>, vector<1x1x8x8xf32>,
    %59 = vector.extract_strided_slice %6 {offsets = [0, 88], sizes = [8, 8], strides = [1, 1]} : vector<8x96xf32> to vector<8x8xf32>
    %c0_51 = arith.constant 0 : index
    %c3_52 = arith.constant 3 : index
    %c0_53 = arith.constant 0 : index
    %c0_54 = arith.constant 0 : index
    %60 = vector.load %arg7[%c0_51, %c3_52, %c0_53, %c0_54] : memref<1x4x8x8xf32, #tpu.memory_space<vmem>>, vector<1x1x8x8xf32>
    %61 = vector.shape_cast %60 : vector<1x1x8x8xf32> to vector<8x8xf32>
    %62 = vector.shape_cast %59 : vector<8x8xf32> to vector<1x1x8x8xf32>
    tpu.vector_store %arg7[%c0_51, %c3_52, %c0_53, %c0_54], %62 {strides = array<i32>} : memref<1x4x8x8xf32, #tpu.memory_space<vmem>>, vector<1x1x8x8xf32>,
    return
  }
  func.func @transform_0(%arg0: i32, %arg1: i32) -> (i32, i32, i32) {
    %c0_i32 = arith.constant 0 : i32
    %c0_i32_0 = arith.constant 0 : i32
    return %arg0, %arg1, %c0_i32 : i32, i32, i32
  }
  func.func @transform_1(%arg0: i32, %arg1: i32) -> (i32, i32) {
    %c0_i32 = arith.constant 0 : i32
    %c0_i32_0 = arith.constant 0 : i32
    %c0_i32_1 = arith.constant 0 : i32
    return %c0_i32, %c0_i32_0 : i32, i32
  }
  func.func @transform_2(%arg0: i32, %arg1: i32) -> (i32, i32) {
    %c0_i32 = arith.constant 0 : i32
    %c0_i32_0 = arith.constant 0 : i32
    %c0_i32_1 = arith.constant 0 : i32
    return %c0_i32, %c0_i32_0 : i32, i32
  }
  func.func @transform_3(%arg0: i32, %arg1: i32) -> (i32, i32, i32, i32) {
    %c0_i32 = arith.constant 0 : i32
    %c0_i32_0 = arith.constant 0 : i32
    %c0_i32_1 = arith.constant 0 : i32
    return %arg0, %c0_i32, %arg1, %c0_i32_0 : i32, i32, i32, i32
  }
  func.func @transform_4(%arg0: i32, %arg1: i32) -> (i32, i32, i32, i32) {
    %c0_i32 = arith.constant 0 : i32
    %c0_i32_0 = arith.constant 0 : i32
    %c0_i32_1 = arith.constant 0 : i32
    return %arg0, %c0_i32, %arg1, %c0_i32_0 : i32, i32, i32, i32
  }
  func.func @transform_5(%arg0: i32, %arg1: i32) -> (i32, i32, i32, i32) {
    %c0_i32 = arith.constant 0 : i32
    %c0_i32_0 = arith.constant 0 : i32
    %c0_i32_1 = arith.constant 0 : i32
    return %arg0, %c0_i32, %arg1, %c0_i32_0 : i32, i32, i32, i32
  }
}

</mosaic_0001>

<bundles_post_ra>
// kernel: tpu_custom_call.1
= control target key start
LH: loop header
LB: loop body
LE: loop exit
PB: predicated region body
PF: predicated region fallthrough
CT: control target
= control target key end

     0   :  { %s1243_s0 = inlined_call_operand.hbm [shape: f32[2,8,32], index: 0, kind: input, shape index: {}]   ;;  %s1244_s1 = inlined_call_operand.hbm [shape: f32[32,96], index: 1, kind: input, shape index: {}]   ;;  %s1245_s2 = inlined_call_operand.vmem [shape: f32[1,96], index: 2, kind: input, shape index: {}]   ;;  %s1246_s3 = inlined_call_operand.hbm [shape: f32[2,4,8,8], index: 3, kind: output, shape index: {0}]   ;;  %s1247_s4 = inlined_call_operand.hbm [shape: f32[2,4,8,8], index: 4, kind: output, shape index: {1}]   ;;  %s1248_s5 = inlined_call_operand.hbm [shape: f32[2,4,8,8], index: 5, kind: output, shape index: {2}]  }
   0x1   :  { %1252 = sst [smem:[#allocation15_spill]] %s1243_s0 }
   0x2   :  { %11 = vsyncpa [#allocation3], 0 }
   0x3   :  { %13 = vsyncpa [#allocation3 + $0x1], 0 }
   0x4   :  { %14 = vsyncpa [#allocation6], 0 }
   0x5   :  { %15 = vsyncpa [#allocation4], 0 }
   0x6   :  { %17 = vsyncpa [#allocation4 + $0x1], 0 }
   0x7   :  { %18 = vsyncpa [#allocation9], 0 }
   0x8   :  { %20 = vsyncpa [#allocation9 + $0x1], 0  ;;  %s1003_s18 = smov 0   ;;  %s1005_s19 = smov 0  }
   0x9   :  { %s1007_s20 = smov 0   ;;  %s1009_s21 = smov 0  }
   0xa   :  { %s1011_s22 = smov 0   ;;  %s1013_s23 = smov 0  }
   0xb LB: > { %s1034_s24 = sadd.s32 4294967295, %s955_s23   ;;  %p615_p0 = scmp.ge.s32.totalorder %s955_s23, 1  ;;  %s955_s23 = sphi %s1013_s23, %s26_s23   ;;  %s951_s22 = sphi %s1011_s22, %s1265_s22   ;;  %s947_s21 = sphi %s1009_s21, %s1264_s21   ;;  %s943_s20 = sphi %s1007_s20, %s1263_s20   ;;  %s939_s19 = sphi %s1005_s19, %s1262_s19   ;;  %s935_s18 = sphi %s1003_s18, %s1261_s18  }
   0xc   : > { %p61_p1 = scmp.eq.s32.totalorder %s1034_s24, 0  ;;  %p197_p2 = scmp.lt.s32.totalorder %s955_s23, 3 }
   0xd   : > { %s208_s27 = sshll.u32 %s1244_s1, 4  ;;  %s957_s29 = smov [#allocation5]   ;;  %s209_s27 = int_to_ptr.hbm [resolvable:$true] %s208_s27 }
   0xe   : > { %p1042_p3 = pnand %p615_p0, %p197_p2  ;;  %s210_s30 = sshll.u32 %s957_s29, 4  ;;  %s211_s30 = int_to_ptr.vmem [resolvable:$true] %s210_s30 }
   0xf   : > { %p617_p6 = scmp.ge.s32.totalorder %s955_s23, 2  ;;  %s958_s6 = smov 128  }
  0x10   : > { %p662_p4 = pneg %p1042_p3  ;;  %s959_s7 = smov 8  }
  0x11   : > { %s1249_s8 = sadd.s32 4294967294, %s955_s23   ;;  %s38_s9 = sadd.s32 1, %s951_s22 }
  0x12   : > { %p663_p5 = pnand %p662_p4, %p61_p1  ;;  %s47_s10 = sadd.s32 1, %s943_s20 }
  0x13   : > { %p40_p7 = scmp.ge.s32.totalorder %s38_s9, 2  ;;  %p54_p8 = scmp.ne.s32.totalorder %s943_s20, %s939_s19 }
  0x14   : > { %665 = dma.hbm_to_vmem [thread:$0]  (!%p663_p5), %s209_s27, 512, %s211_s30, [#allocation6], %s958_s6, %s958_s6, %s959_s7  }
  0x15   : > { %p55_p9 = scmp.eq.s32.totalorder %s955_s23, 0  ;;  %p60_p10 = scmp.ne.s32.totalorder %s939_s19, %s935_s18 }
  0x16   : > { %s1267_s9 = smov (%p40_p7, %s38_s9), 0  ;;  %p128_p13 = scmp.eq.s32.totalorder %s1034_s24, 1 }
  0x17   : > { %p1061_p11 = por %p55_p9, %p54_p8  ;;  %p1067_p12 = por %p61_p1, %p60_p10 }
  0x18   : > { %s42_s13 = ssub.s32 %s951_s22, %s1267_s9  ;;  %p134_p2 = scmp.eq.s32.totalorder %s1249_s8, 1 }
  0x19   : > { %p45_p0 = scmp.eq.s32.totalorder %s42_s13, 0  ;;  %p1076_p4 = por %p128_p13, %p54_p8 }
  0x1a   : > { %p681_p5 = scmp.lt.s32.totalorder %s955_s23, 2  ;;  %p1084_p7 = por %p134_p2, %p60_p10 }
  0x1b   : > { %s1082_s15 = scalar_select %p45_p0, %s943_s20, %s47_s10  }
  0x1c   : > { %s227_s17 = sand.u32 1, %s943_s20   ;;  %s619_s26 = sshll.u32 %s951_s22, 3 }
  0x1d   : > { %s618_s25 = sshll.u32 %s227_s17, 3  ;;  %s1258_s0 = sld [smem:[#allocation15_spill]] }
  0x1e   : > { %s231_s6 = scalar_lea.vmem [#allocation2], %s618_s25  ;;  %p667_p8 = pnand %p681_p5, %p1061_p11 }
  0x1f   : > { %s240_s7 = sshll.u32 %s231_s6, 4  ;;  %s228_s10 = scalar_lea.sflag [#allocation3], %s227_s17  ;;  %s241_s7 = int_to_ptr.vmem [resolvable:$true] %s240_s7 }
  0x20   : > { %s1098_s8 = sand.u32 (!%p1042_p3), 1, %s939_s19  }
  0x21   : > { %249 = sbr.rel (%p1042_p3) target bundleno = 332 (0x14c), region = 32  ;;  %s621_s27 = sshll.u32 (!%p1042_p3), %s1098_s8, 3 }
  0x22   : > { %s255_s25 = scalar_lea.vmem (!%p1042_p3), [#allocation2], %s621_s27 }
  0x23   : > { %s236_s30 = scalar_lea.hbm %s1258_s0, %s619_s26  ;;  %s252_s26 = scalar_lea.sflag (!%p1042_p3), [#allocation3], %s1098_s8 }
  0x24   : > { %s238_s13 = sshll.u32 %s236_s30, 4  ;;  %s239_s13 = int_to_ptr.hbm [resolvable:$true] %s238_s13 }
  0x25   : > { %669 = dma.hbm_to_vmem [thread:$0]  (!%p667_p8), %s239_s13, 128, %s241_s7, %s228_s10  }
  0x26   : > { %918 = dma.done.wait (%p1067_p12), %s252_s26, 128  }
  0x27   : > { %920 = vsyncadd (%p1067_p12), %s252_s26, 4294967168 }
  0x28   : > { %922 = dma.done.wait (%p61_p1), [#allocation6], 512  }
  0x29   : > { %924 = vsyncadd (%p61_p1), [#allocation6], 4294966784  ;;  %v302_v0 = vld [vmem:[#allocation5 + $0x18] sm:$0xff]  ;;  %v301_v1 = vld [vmem:[#allocation5 + $0x10] sm:$0xff]  ;;  %vm307_vm0 = vcmask 261120   ;;  %s1114_s12 = sshll.u32 %s1098_s8, 5 }
  0x2a   : > { %323 = vmatpush.msra.mxu0 %v302_v0  ;;  %v300_v2 = vld [vmem:[#allocation5 + $0x8] sm:$0xff]  ;;  %v299_v3 = vld [vmem:[#allocation5] sm:$0xff]  ;;  %v298_v4 = vld [vmem:[%s255_s25] sm:$0xff]  ;;  %vm332_vm1 = vcmask 64512   ;;  %s960_s17 = smov 64   ;;  %s961_s29 = smov 80  }
  0x2b   : > { %v748_v5 = vld [vmem:[%s1245_s2] ss:$0 sm:$0xff]  ;;  %s962_s30 = smov 96   ;;  %s1117_s6 = scalar_lea.vmem [#allocation7], %s1114_s12 }
  0x2c   : > { %324 = vmatpush.msra.mxu0 %v301_v1  ;;  %s963_s7 = smov 72   ;;  %s964_s13 = smov 120  }
  0x2d   : > { %s965_s10 = smov 88   ;;  %s966_s27 = smov 112  }
  0x2e   : > { %325 = vmatpush.msra.mxu0 %v300_v2  ;;  %s967_s26 = smov 48   ;;  %s968_s25 = smov 56  }
  0x2f   : > { %s969_s28 = smov 40   ;;  %s970_s11 = smov 104  }
  0x30   : > { %326 = vmatpush.msra.mxu0 %v299_v3 }
  0x31   : > { %626 = vmatmul.msk.f32.vlgmr.msra.gmra.mxu0 %vm307_vm0, %v298_v4 }
  0xae   : > { %v328_v6 = vpop.f32.mrf.mxu0 }
  0xaf   : > { %v329_v7 = vadd.f32 %v748_v5, %v328_v6 }
  0xb1   : > { %339 = vrot.lane.b32.xlu2 %v329_v7, %s960_s17  ;;  %364 = vrot.lane.b32.xlu1 %v329_v7, %s961_s29  ;;  %v331_v8 = vmul.f32 0.17677669, %v329_v7  ;;  %s1122_s17 = scalar_lea.vmem [#allocation10], %s1114_s12  ;;  %s1131_s29 = sshll.u32 %s947_s21, 5 }
  0xb2   : > { %335 = vrot.lane.b32.xlu0 %v329_v7, %s962_s30  ;;  %s290_s30 = scalar_lea.vmem [#allocation8], %s1114_s12 }
  0xb3   : > { %333 = vst.msk [vmem:[%s1117_s6] sm:$0xff] %vm332_vm1, %v331_v8 }
  0xb9   : > { %379 = vrot.lane.b32.xlu1 %v329_v7, %s963_s7  ;;  %344 = vrot.lane.b32.xlu2 %v331_v8, %s964_s13  ;;  %s829_s7 = scalar_lea.hbm %s1247_s4, 64 }
  0xba   : > { %349 = vrot.lane.b32.xlu0 %v329_v7, %s965_s10  ;;  %s430_s10 = scalar_lea.hbm %s1247_s4, %s1131_s29 }
  0xc1   : > { %359 = vrot.lane.b32.xlu1 %v331_v8, %s966_s27  ;;  %369 = vrot.lane.b32.xlu2 %v329_v7, %s967_s26  ;;  %s431_s27 = sshll.u32 %s290_s30, 4  ;;  %s394_s26 = sand.u32 1, %s1034_s24   ;;  %s432_s27 = int_to_ptr.vmem [resolvable:$true] %s431_s27 }
  0xc2   : > { %354 = vrot.lane.b32.xlu0 %v329_v7, %s968_s25  ;;  %s433_s25 = sshll.u32 %s430_s10, 4  ;;  %s1143_s21 = scalar_lea.sflag [#allocation9], %s394_s26  ;;  %s434_s25 = int_to_ptr.hbm [resolvable:$true] %s433_s25 }
  0xc3   : > { %s823_s12 = sshra.s32 %s434_s25, 4  ;;  %s824_s12 = int_to_ptr.hbm [resolvable:$true] %s823_s12 }
  0xc4   : > { %p830_p10 = scmp.lt.s32.totalorder %s824_s12, %s1247_s4 }
  0xc9   : > { %384 = vrot.lane.b32.xlu1 %v329_v7, %s969_s28  ;;  %s825_s28 = scalar_lea.hbm %s824_s12, 32 }
  0xca   : > { %374 = vrot.lane.b32.xlu0 %v331_v8, %s970_s11  ;;  %p826_p1 = scmp.ne.s32.totalorder %s824_s12, %s825_s28  ;;  %p831_p11 = scmp.lt.s32.totalorder %s829_s7, %s825_s28 }
  0xcc   : > { %p827_p3 = pnand %p826_p1, %p1076_p4  ;;  %p832_p12 = por %p831_p11, %p830_p10 }
  0xce   : > { %p828_p9 = pneg %p827_p3 }
  0xd0   : > { %p833_p13 = pnand %p832_p12, %p828_p9 }
 0x10b   : > { %v340_v9 = vpop.permute.xlu2 %339 }
 0x10c   : > { %342 = vst.msk [vmem:[%s1122_s17] sm:$0xff] %vm332_vm1, %v340_v9 }
 0x113   : > { %v345_v10 = vpop.permute.xlu2 %344 }
 0x114   : > { %627 = vst.msk [vmem:[%s1117_s6 + $0x8] sm:$0xff] %vm332_vm1, %v345_v10 }
 0x11b   : > { %v370_v11 = vpop.permute.xlu2 %369 }
 0x11c   : > { %632 = vst.msk [vmem:[%s1122_s17 + $0x10] sm:$0xff] %vm332_vm1, %v370_v11 }
 0x123   : > { %v365_v12 = vpop.permute.xlu1 %364 }
 0x124   : > { %631 = vst.msk [vmem:[%s290_s30 + $0x10] sm:$0xff] %vm332_vm1, %v365_v12  ;;  %v336_v13 = vpop.permute.xlu0 %335 }
 0x125   : > { %338 = vst.msk [vmem:[%s290_s30] sm:$0xff] %vm332_vm1, %v336_v13 }
 0x12b   : > { %v380_v14 = vpop.permute.xlu1 %379 }
 0x12c   : > { %634 = vst.msk [vmem:[%s290_s30 + $0x18] sm:$0xff] %vm332_vm1, %v380_v14  ;;  %v350_v15 = vpop.permute.xlu0 %349 }
 0x12d   : > { %628 = vst.msk [vmem:[%s290_s30 + $0x8] sm:$0xff] %vm332_vm1, %v350_v15 }
 0x12e   : > { %836 = shalt.err (!%p833_p13)
}
 0x12f   : > { %s1250_s30 = smov 128   ;;  %s972_s26 = smov 8  }
 0x130   : > { %657 = dma.vmem_to_hbm [thread:$0]  (%p1076_p4), %s432_s27, 512, %s434_s25, %s1143_s21, %s1250_s30, %s1250_s30, %s972_s26  }
 0x131   : > { %s412_s11 = scalar_lea.hbm %s1246_s3, %s1131_s29  ;;  %s448_s13 = scalar_lea.hbm %s1248_s5, %s1131_s29 }
 0x132   : > { %s413_s10 = sshll.u32 %s1117_s6, 4  ;;  %s1172_s0 = sshll.u32 %s412_s11, 4  ;;  %s414_s10 = int_to_ptr.vmem [resolvable:$true] %s413_s10  ;;  %s416_s0 = int_to_ptr.hbm [resolvable:$true] %s1172_s0 }
 0x133   : > { %v360_v16 = vpop.permute.xlu1 %359  ;;  %s449_s27 = sshll.u32 %s1122_s17, 4  ;;  %s1175_s25 = sshll.u32 %s448_s13, 4  ;;  %s1178_s27 = int_to_ptr.vmem [resolvable:$true] %s449_s27  ;;  %s452_s25 = int_to_ptr.hbm [resolvable:$true] %s1175_s25 }
 0x134   : > { %v355_v17 = vpop.permute.xlu0 %354  ;;  %630 = vst.msk [vmem:[%s1117_s6 + $0x10] sm:$0xff] %vm332_vm1, %v360_v16  ;;  %s390_s29 = scalar_lea.sflag [#allocation4], %s1098_s8  ;;  %s851_s12 = sshra.s32 %s416_s0, 4  ;;  %s852_s12 = int_to_ptr.hbm [resolvable:$true] %s851_s12 }
 0x135   : > { %629 = vst.msk [vmem:[%s1122_s17 + $0x8] sm:$0xff] %vm332_vm1, %v355_v17  ;;  %s853_s28 = scalar_lea.hbm %s852_s12, 32  ;;  %s857_s7 = scalar_lea.hbm %s1246_s3, 64 }
 0x136   : > { %p854_p0 = scmp.ne.s32.totalorder %s852_s12, %s853_s28  ;;  %p858_p8 = scmp.lt.s32.totalorder %s852_s12, %s1246_s3 }
 0x137   : > { %p859_p1 = scmp.lt.s32.totalorder %s857_s7, %s853_s28 }
 0x138   : > { %p855_p2 = pnand %p854_p0, %p1076_p4 }
 0x139   : > { %p860_p3 = por %p859_p1, %p858_p8 }
 0x13a   : > { %p856_p5 = pneg %p855_p2 }
 0x13b   : > { %v385_v18 = vpop.permute.xlu1 %384 }
 0x13c   : > { %v375_v19 = vpop.permute.xlu0 %374  ;;  %635 = vst.msk [vmem:[%s1122_s17 + $0x18] sm:$0xff] %vm332_vm1, %v385_v18  ;;  %p861_p9 = pnand %p860_p3, %p856_p5 }
 0x13d   : > { %633 = vst.msk [vmem:[%s1117_s6 + $0x18] sm:$0xff] %vm332_vm1, %v375_v19 }
 0x13e   : > { %864 = shalt.err (!%p861_p9)
}
 0x13f   : > { %s1259_s8 = smov 128   ;;  %s879_s6 = sshra.s32 %s452_s25, 4  ;;  %s880_s6 = int_to_ptr.hbm [resolvable:$true] %s879_s6 }
 0x140   : > { %656 = dma.vmem_to_hbm [thread:$0]  (%p1076_p4), %s414_s10, 512, %s416_s0, %s390_s29, %s1259_s8, %s1259_s8, %s972_s26  }
 0x141   : > { %s881_s17 = scalar_lea.hbm %s880_s6, 32  ;;  %s885_s28 = scalar_lea.hbm %s1248_s5, 64 }
 0x142   : > { %p882_p10 = scmp.ne.s32.totalorder %s880_s6, %s881_s17  ;;  %p886_p13 = scmp.lt.s32.totalorder %s880_s6, %s1248_s5 }
 0x143   : > { %p887_p0 = scmp.lt.s32.totalorder %s885_s28, %s881_s17 }
 0x144   : > { %p883_p11 = pnand %p882_p10, %p1076_p4 }
 0x145   : > { %p888_p2 = por %p887_p0, %p886_p13 }
 0x146   : > { %p884_p12 = pneg %p883_p11 }
 0x148   : > { %p889_p5 = pnand %p888_p2, %p884_p12 }
 0x14a   : > { %892 = shalt.err (!%p889_p5)
}
 0x14b   : > { %658 = dma.vmem_to_hbm [thread:$0]  (%p1076_p4), %s1178_s27, 512, %s452_s25, %s1143_s21, %s1259_s8, %s1259_s8, %s972_s26  }
 0x14c PF: > { %s466_s0 = sand.u32 1, %s935_s18   ;;  %p671_p8 = pnand %p617_p6, %p1084_p7 }
 0x14d   : > { %s467_s10 = scalar_lea.sflag [#allocation4], %s466_s0 }
 0x14e   : > { %p672_p1 = pneg %p671_p8 }
 0x150   : > { %926 = dma.done.wait (%p672_p1), %s467_s10, 512  }
 0x151   : > { %928 = vsyncadd (%p672_p1), %s467_s10, 4294966784  ;;  %s1260_s14 = sadd.s32 4294967294, %s955_s23  }
 0x152   : > { %s476_s29 = sand.u32 1, %s1260_s14  }
 0x153   : > { %s477_s7 = scalar_lea.sflag [#allocation9], %s476_s29 }
 0x154   : > { %930 = dma.done.wait (%p672_p1), %s477_s7, 1024  }
 0x155   : > { %932 = vsyncadd (%p672_p1), %s477_s7, 4294966272  ;;  %s26_s23 = sadd.s32 1, %s955_s23   ;;  %s1261_s18 = smov %s939_s19 }
 0x156   : > { %p23_p4 = scmp.ge.s32.totalorder %s26_s23, 4   ;;  %s1262_s19 = smov %s943_s20 }
 0x157   : > { %s1263_s20 = smov %s1082_s15  ;;  %s1264_s21 = smov %s951_s22 }
 0x158   : > { %s1265_s22 = smov %s1267_s9  ;;  %25 = sbr.rel (!%p23_p4) target bundleno = 11 (0xb), region = 122 }
 0x15d   :  { %493 = vsyncpa [#allocation3], 1 }
 0x15e   :  { %495 = vsyncpa [#allocation3 + $0x1], 1 }
 0x15f   :  { %496 = vsyncpa [#allocation6], 1 }
 0x160   :  { %497 = vsyncpa [#allocation4], 1 }
 0x161   :  { %499 = vsyncpa [#allocation4 + $0x1], 1 }
 0x162   :  { %500 = vsyncpa [#allocation9], 1 }
 0x163   :  { %502 = vsyncpa [#allocation9 + $0x1], 1 }

</bundles_post_ra>
